<compile_context>
chip_gen: v5e
topology: v5e:2x2
jax: 0.10.0
libtpu: 0.0.40
codegen_flags: <defaults>
</compile_context>

<pallas_src>
import functools
import math

import jax
import jax.numpy as jnp
from jax.experimental import pallas as pl
from jax.experimental.pallas import tpu as pltpu


def _instance_norm_cl(z, eps=1e-5):
    # PyTorch InstanceNorm1d(affine=False, track_running_stats=False) on a
    # channel-major (C, L) block: per-channel stats over L (lane axis), biased
    # variance, fp32 math, rsqrt on the EUP.
    mean = jnp.mean(z, axis=-1, keepdims=True)
    var = jnp.mean((z - mean) ** 2, axis=-1, keepdims=True)
    return (z - mean) * jax.lax.rsqrt(var + eps)


# --------------------------- fused encoder-layer kernel ---------------------------
def _encoder_layer_kernel(x_ref, wqkv_ref, bqkv_ref, wo_ref, bo_ref,
                          w1_ref, b1_ref, w2_ref, b2_ref, o_ref,
                          *, n_heads, d_head, window_size, activation):
    f32, bf16 = jnp.float32, jnp.bfloat16
    x_in = x_ref[...]                                   # (D, L) channel-major, bf16 I/O
    D, L = x_in.shape
    W = window_size
    nw = L // W
    x_f32 = x_in.astype(f32)                            # fp32 copy for the residual

    # ---- fused QKV projection (one (D,3D) MXU op); 1/sqrt(d_head) already folded ----
    qkv = jnp.einsum("dl,de->le", x_in.astype(bf16), wqkv_ref[...],
                     preferred_element_type=f32) + bqkv_ref[...]        # (L, 3D)
    q, k, v = qkv[:, :D], qkv[:, D:2 * D], qkv[:, 2 * D:]

    # ---- window-batched local attention: scores are only (H*nw, W, W) ----
    def to_windows(t):                                  # (L, D) -> (H*nw, W, d_head)
        parts = [t[:, h * d_head:(h + 1) * d_head].reshape(nw, W, d_head)
                 for h in range(n_heads)]
        return jnp.concatenate(parts, axis=0).astype(bf16)

    qw, kw, vw = to_windows(q), to_windows(k), to_windows(v)
    s = jnp.einsum("bqd,bkd->bqk", qw, kw, preferred_element_type=f32)  # (H*nw, W, W)
    s = s - jnp.max(s, axis=-1, keepdims=True)          # fp32 softmax
    e = jnp.exp(s)
    p = e * pl.reciprocal(jnp.sum(e, axis=-1, keepdims=True), approx=True)
    ow = jnp.einsum("bqk,bkd->bqd", p.astype(bf16), vw,
                    preferred_element_type=f32)                          # (H*nw, W, d_head)
    attn = jnp.concatenate(
        [ow[h * nw:(h + 1) * nw].reshape(L, d_head) for h in range(n_heads)],
        axis=-1)                                                         # (L, D)

    # ---- output projection (back to channel-major) + residual + InstanceNorm1d ----
    attn_dl = jnp.einsum("ed,ld->el", wo_ref[...], attn.astype(bf16),
                         preferred_element_type=f32) + bo_ref[...]       # (D, L)
    h1 = _instance_norm_cl(x_f32 + attn_dl)                              # norm1 (post-LN)

    # ---- position-wise FFN (1x1 convs as channel-major matmuls) ----
    f = jnp.einsum("fd,dl->fl", w1_ref[...], h1.astype(bf16),
                   preferred_element_type=f32) + b1_ref[...]             # (d_ff, L)
    if activation == "relu":
        f = jnp.maximum(f, 0.0)
    else:
        # erf-form GELU for parity with PyTorch's default F.gelu (only traced if selected)
        f = 0.5 * f * (1.0 + jax.lax.erf(f * (1.0 / math.sqrt(2.0))))
    f = jnp.einsum("ef,fl->el", w2_ref[...], f.astype(bf16),
                   preferred_element_type=f32) + b2_ref[...]             # (D, L)

    o_ref[...] = _instance_norm_cl(h1 + f).astype(o_ref.dtype)           # norm2 (post-LN)


# ------------------------------------ wrapper ------------------------------------
def prepare_params(p, *, n_heads):
    """One-time param prep: fuse QKV (with 1/sqrt(d_head) folded into the Q slice),
    transpose to channel-major, cast matmul weights to bf16 (biases stay fp32)."""
    bf16, f32 = jnp.bfloat16, jnp.float32
    D = p["wq"].shape[0]
    scale = 1.0 / math.sqrt(D // n_heads)
    return dict(
        wqkv=jnp.concatenate([p["wq"] * scale, p["wk"], p["wv"]], axis=1).astype(bf16),  # (D, 3D)
        bqkv=jnp.concatenate([p["bq"] * scale, p["bk"], p["bv"]], axis=1).astype(f32),   # (1, 3D)
        wo_t=p["wo"].T.astype(bf16),                 # (D_out, D_in)
        bo_c=p["bo"].reshape(-1, 1).astype(f32),     # (D, 1)
        w1_t=p["w1"].T.astype(bf16),                 # (d_ff, D)
        b1_c=p["b1"].reshape(-1, 1).astype(f32),     # (d_ff, 1)
        w2_t=p["w2"].T.astype(bf16),                 # (D, d_ff)
        b2_c=p["b2"].reshape(-1, 1).astype(f32),     # (D, 1)
    )


def encoder_layer_forward(x_ncl, params, mask=None, *, l_seg, window_size,
                          n_heads, activation="relu", io_dtype=jnp.bfloat16):
    """x_ncl: (B, d_model, L) as in PyTorch. Returns (out_ncl, attn=None)."""
    del mask, l_seg  # TODO(synk): unused (LocalAttention reference not given)
    B, D, L = x_ncl.shape
    assert L % window_size == 0 and D % n_heads == 0
    d_head = D // n_heads
    d_ff = params["w1_t"].shape[0]

    x = x_ncl.astype(io_dtype)                        # bf16 activation streaming

    x_spec = pl.BlockSpec((None, D, L), lambda b: (b, 0, 0))   # per-batch block

    def wspec(shape):
        # Resident weights (constant index_map across the grid).
        # TODO(synk): pipeline_mode=pl.Buffered(1) would single-buffer these on
        # v7x for extra VMEM headroom once that path is verified on this toolchain.
        return pl.BlockSpec(shape, lambda b: (0, 0))

    kernel = functools.partial(_encoder_layer_kernel, n_heads=n_heads,
                               d_head=d_head, window_size=window_size,
                               activation=activation)

    # Advisory cost estimate so XLA schedules surrounding ops sensibly.
    weight_bytes = sum(int(v.size) * v.dtype.itemsize for v in params.values())
    io_item = jnp.dtype(io_dtype).itemsize
    cost = pl.CostEstimate(
        flops=int(2 * B * L * D * (4 * D + 2 * d_ff + 2 * window_size)),
        transcendentals=int(B * n_heads * L * window_size),
        bytes_accessed=int(2 * B * D * L * io_item) + weight_bytes)

    # Per-generation scoped-VMEM budget: ~3/4 of physical (v7x ~48 MiB, v5e/v6e ~96 MiB).
    try:
        phys_vmem = int(pltpu.get_tpu_info().vmem_capacity_bytes)
    except Exception:
        phys_vmem = 64 * 1024 * 1024
    vmem_limit = (phys_vmem * 3) // 4

    out = pl.pallas_call(
        kernel,
        grid=(B,),  # v7x: 2 TCs split the batch (use even B so neither core idles)
        in_specs=[x_spec,
                  wspec((D, 3 * D)), wspec((1, 3 * D)),
                  wspec((D, D)), wspec((D, 1)),
                  wspec((d_ff, D)), wspec((d_ff, 1)),
                  wspec((D, d_ff)), wspec((D, 1))],
        out_specs=x_spec,
        out_shape=jax.ShapeDtypeStruct((B, D, L), io_dtype),
        compiler_params=pltpu.CompilerParams(
            dimension_semantics=("parallel",),
            vmem_limit_bytes=int(vmem_limit)),
        cost_estimate=cost,
    )(x, params["wqkv"], params["bqkv"], params["wo_t"], params["bo_c"],
      params["w1_t"], params["b1_c"], params["w2_t"], params["b2_c"])

    return out, None                                   # return_attn=False


# -------------------------------------- main --------------------------------------
if __name__ == "__main__":
    B, D, L = 2, 32, 16            # batch, d_model, sequence length
    n_heads, d_ff = 4, 64
    l_seg, window_size = 4, 8

    key = jax.random.PRNGKey(0)
    ks = jax.random.split(key, 13)

    def init(k, shape, scale=0.02):
        return (scale * jax.random.normal(k, shape)).astype(jnp.float32)

    raw_params = dict(
        # attention projections (stored as (in, out) for x @ W)
        wq=init(ks[0], (D, D)), bq=init(ks[1], (1, D)),
        wk=init(ks[2], (D, D)), bk=init(ks[3], (1, D)),
        wv=init(ks[4], (D, D)), bv=init(ks[5], (1, D)),
        wo=init(ks[6], (D, D)), bo=init(ks[7], (1, D)),
        # conv1 (d_model -> d_ff, kernel 1) / conv2 (d_ff -> d_model, kernel 1)
        w1=init(ks[8], (D, d_ff)), b1=init(ks[9], (1, d_ff)),
        w2=init(ks[10], (d_ff, D)), b2=init(ks[11], (1, D)),
    )
    params = prepare_params(raw_params, n_heads=n_heads)

    x = jax.random.normal(ks[12], (B, D, L), dtype=jnp.float32)  # PyTorch NCL input

    out, attn = encoder_layer_forward(
        x, params, mask=None, l_seg=l_seg, window_size=window_size,
        n_heads=n_heads, activation="relu")
    out = jax.block_until_ready(out)

    assert out.shape == (B, D, L) and out.dtype == jnp.bfloat16
    assert bool(jnp.all(jnp.isfinite(out.astype(jnp.float32))))
    print("KERNEL_OK")
</pallas_src>

<mosaic_0001>
module attributes {stable_mosaic.version = 11 : i64} {
  func.func @_encoder_layer_kernel(%arg0: i32, %arg1: memref<1x32x16xbf16, #tpu.memory_space<vmem>>, %arg2: memref<32x96xbf16, #tpu.memory_space<vmem>>, %arg3: memref<1x96xf32, #tpu.memory_space<vmem>>, %arg4: memref<32x32xbf16, #tpu.memory_space<vmem>>, %arg5: memref<32x1xf32, #tpu.memory_space<vmem>>, %arg6: memref<64x32xbf16, #tpu.memory_space<vmem>>, %arg7: memref<64x1xf32, #tpu.memory_space<vmem>>, %arg8: memref<32x64xbf16, #tpu.memory_space<vmem>>, %arg9: memref<32x1xf32, #tpu.memory_space<vmem>>, %arg10: memref<1x32x16xbf16, #tpu.memory_space<vmem>>) attributes {dimension_semantics = [#tpu.dimension_semantics<parallel>], iteration_bounds = array<i64: 2>, scalar_prefetch = 0 : i64, scratch_operands = 0 : i64, tpu.core_type = #tpu.core_type<tc>, window_params = [{transform_indices = @transform_0, window_bounds = array<i64: 1, 32, 16>}, {pipeline_mode = #tpu.pipeline_mode<synchronous>, transform_indices = @transform_1, window_bounds = array<i64: 32, 96>}, {pipeline_mode = #tpu.pipeline_mode<synchronous>, transform_indices = @transform_2, window_bounds = array<i64: 1, 96>}, {pipeline_mode = #tpu.pipeline_mode<synchronous>, transform_indices = @transform_3, window_bounds = array<i64: 32, 32>}, {pipeline_mode = #tpu.pipeline_mode<synchronous>, transform_indices = @transform_4, window_bounds = array<i64: 32, 1>}, {pipeline_mode = #tpu.pipeline_mode<synchronous>, transform_indices = @transform_5, window_bounds = array<i64: 64, 32>}, {pipeline_mode = #tpu.pipeline_mode<synchronous>, transform_indices = @transform_6, window_bounds = array<i64: 64, 1>}, {pipeline_mode = #tpu.pipeline_mode<synchronous>, transform_indices = @transform_7, window_bounds = array<i64: 32, 64>}, {pipeline_mode = #tpu.pipeline_mode<synchronous>, transform_indices = @transform_8, window_bounds = array<i64: 32, 1>}, {transform_indices = @transform_9, window_bounds = array<i64: 1, 32, 16>}]} {
    %c0 = arith.constant 0 : index
    %c0_0 = arith.constant 0 : index
    %c0_1 = arith.constant 0 : index
    %0 = vector.load %arg1[%c0, %c0_0, %c0_1] : memref<1x32x16xbf16, #tpu.memory_space<vmem>>, vector<1x32x16xbf16>
    %1 = vector.shape_cast %0 : vector<1x32x16xbf16> to vector<32x16xbf16>
    %2 = arith.extf %1 : vector<32x16xbf16> to vector<32x16xf32>
    %c0_2 = arith.constant 0 : index
    %c0_3 = arith.constant 0 : index
    %3 = vector.load %arg2[%c0_2, %c0_3] : memref<32x96xbf16, #tpu.memory_space<vmem>>, vector<32x96xbf16>
    "tpu.trace_start"() <{level = 10 : i32, message = "dl,de->le"}> : () -> ()
    %cst = arith.constant dense<0.000000e+00> : vector<16x96xf32>
    %4 = tpu.matmul %1, %3, %cst {dimension_numbers = #tpu.dot_dimension_numbers<[0], [0], [1], [1], [0, 1, 1, 1], [], []>} : vector<32x16xbf16>, vector<32x96xbf16>, vector<16x96xf32> -> vector<16x96xf32>
    "tpu.trace_stop"() : () -> ()
    %c0_4 = arith.constant 0 : index
    %c0_5 = arith.constant 0 : index
    %5 = vector.load %arg3[%c0_4, %c0_5] : memref<1x96xf32, #tpu.memory_space<vmem>>, vector<1x96xf32>
    %6 = vector.broadcast %5 : vector<1x96xf32> to vector<16x96xf32>
    %7 = arith.addf %4, %6 : vector<16x96xf32>
    %8 = vector.extract_strided_slice %7 {offsets = [0, 0], sizes = [16, 32], strides = [1, 1]} : vector<16x96xf32> to vector<16x32xf32>
    %9 = vector.extract_strided_slice %7 {offsets = [0, 32], sizes = [16, 32], strides = [1, 1]} : vector<16x96xf32> to vector<16x32xf32>
    %10 = vector.extract_strided_slice %7 {offsets = [0, 64], sizes = [16, 32], strides = [1, 1]} : vector<16x96xf32> to vector<16x32xf32>
    %11 = vector.extract_strided_slice %8 {offsets = [0, 0], sizes = [16, 8], strides = [1, 1]} : vector<16x32xf32> to vector<16x8xf32>
    %12 = vector.shape_cast %11 : vector<16x8xf32> to vector<2x8x8xf32>
    %13 = vector.extract_strided_slice %8 {offsets = [0, 8], sizes = [16, 8], strides = [1, 1]} : vector<16x32xf32> to vector<16x8xf32>
    %14 = vector.shape_cast %13 : vector<16x8xf32> to vector<2x8x8xf32>
    %15 = vector.extract_strided_slice %8 {offsets = [0, 16], sizes = [16, 8], strides = [1, 1]} : vector<16x32xf32> to vector<16x8xf32>
    %16 = vector.shape_cast %15 : vector<16x8xf32> to vector<2x8x8xf32>
    %17 = vector.extract_strided_slice %8 {offsets = [0, 24], sizes = [16, 8], strides = [1, 1]} : vector<16x32xf32> to vector<16x8xf32>
    %18 = vector.shape_cast %17 : vector<16x8xf32> to vector<2x8x8xf32>
    %19 = tpu.concatenate %12, %14, %16, %18 in 0 : vector<2x8x8xf32>, vector<2x8x8xf32>, vector<2x8x8xf32>, vector<2x8x8xf32> -> vector<8x8x8xf32>
    %20 = arith.truncf %19 : vector<8x8x8xf32> to vector<8x8x8xbf16>
    %21 = vector.extract_strided_slice %9 {offsets = [0, 0], sizes = [16, 8], strides = [1, 1]} : vector<16x32xf32> to vector<16x8xf32>
    %22 = vector.shape_cast %21 : vector<16x8xf32> to vector<2x8x8xf32>
    %23 = vector.extract_strided_slice %9 {offsets = [0, 8], sizes = [16, 8], strides = [1, 1]} : vector<16x32xf32> to vector<16x8xf32>
    %24 = vector.shape_cast %23 : vector<16x8xf32> to vector<2x8x8xf32>
    %25 = vector.extract_strided_slice %9 {offsets = [0, 16], sizes = [16, 8], strides = [1, 1]} : vector<16x32xf32> to vector<16x8xf32>
    %26 = vector.shape_cast %25 : vector<16x8xf32> to vector<2x8x8xf32>
    %27 = vector.extract_strided_slice %9 {offsets = [0, 24], sizes = [16, 8], strides = [1, 1]} : vector<16x32xf32> to vector<16x8xf32>
    %28 = vector.shape_cast %27 : vector<16x8xf32> to vector<2x8x8xf32>
    %29 = tpu.concatenate %22, %24, %26, %28 in 0 : vector<2x8x8xf32>, vector<2x8x8xf32>, vector<2x8x8xf32>, vector<2x8x8xf32> -> vector<8x8x8xf32>
    %30 = arith.truncf %29 : vector<8x8x8xf32> to vector<8x8x8xbf16>
    %31 = vector.extract_strided_slice %10 {offsets = [0, 0], sizes = [16, 8], strides = [1, 1]} : vector<16x32xf32> to vector<16x8xf32>
    %32 = vector.shape_cast %31 : vector<16x8xf32> to vector<2x8x8xf32>
    %33 = vector.extract_strided_slice %10 {offsets = [0, 8], sizes = [16, 8], strides = [1, 1]} : vector<16x32xf32> to vector<16x8xf32>
    %34 = vector.shape_cast %33 : vector<16x8xf32> to vector<2x8x8xf32>
    %35 = vector.extract_strided_slice %10 {offsets = [0, 16], sizes = [16, 8], strides = [1, 1]} : vector<16x32xf32> to vector<16x8xf32>
    %36 = vector.shape_cast %35 : vector<16x8xf32> to vector<2x8x8xf32>
    %37 = vector.extract_strided_slice %10 {offsets = [0, 24], sizes = [16, 8], strides = [1, 1]} : vector<16x32xf32> to vector<16x8xf32>
    %38 = vector.shape_cast %37 : vector<16x8xf32> to vector<2x8x8xf32>
    %39 = tpu.concatenate %32, %34, %36, %38 in 0 : vector<2x8x8xf32>, vector<2x8x8xf32>, vector<2x8x8xf32>, vector<2x8x8xf32> -> vector<8x8x8xf32>
    %40 = arith.truncf %39 : vector<8x8x8xf32> to vector<8x8x8xbf16>
    "tpu.trace_start"() <{level = 10 : i32, message = "bqd,bkd->bqk"}> : () -> ()
    %cst_6 = arith.constant dense<0.000000e+00> : vector<8x8x8xf32>
    %41 = tpu.matmul %20, %30, %cst_6 {dimension_numbers = #tpu.dot_dimension_numbers<[2], [2], [1], [1], [0, 0, 0, 1, 1, 1], [0], [0]>} : vector<8x8x8xbf16>, vector<8x8x8xbf16>, vector<8x8x8xf32> -> vector<8x8x8xf32>
    "tpu.trace_stop"() : () -> ()
    %cst_7 = arith.constant dense<0xFF800000> : vector<8x8xf32>
    %42 = vector.multi_reduction <maximumf>, %41, %cst_7 [2] : vector<8x8x8xf32> to vector<8x8xf32>
    %43 = vector.shape_cast %42 : vector<8x8xf32> to vector<8x8x1xf32>
    %44 = vector.broadcast %43 : vector<8x8x1xf32> to vector<8x8x8xf32>
    %45 = arith.subf %41, %44 : vector<8x8x8xf32>
    %46 = math.exp %45 : vector<8x8x8xf32>
    %cst_8 = arith.constant dense<0.000000e+00> : vector<8x8xf32>
    %47 = vector.multi_reduction <add>, %46, %cst_8 [2] : vector<8x8x8xf32> to vector<8x8xf32>
    %48 = vector.shape_cast %47 : vector<8x8xf32> to vector<8x8x1xf32>
    %49 = tpu.reciprocal %48 {approx = true} : vector<8x8x1xf32> -> vector<8x8x1xf32>
    %50 = vector.broadcast %49 : vector<8x8x1xf32> to vector<8x8x8xf32>
    %51 = arith.mulf %46, %50 : vector<8x8x8xf32>
    %52 = arith.truncf %51 : vector<8x8x8xf32> to vector<8x8x8xbf16>
    "tpu.trace_start"() <{level = 10 : i32, message = "bqk,bkd->bqd"}> : () -> ()
    %cst_9 = arith.constant dense<0.000000e+00> : vector<8x8x8xf32>
    %53 = tpu.matmul %52, %40, %cst_9 {dimension_numbers = #tpu.dot_dimension_numbers<[2], [1], [1], [2], [0, 0, 0, 1, 1, 2], [0], [0]>} : vector<8x8x8xbf16>, vector<8x8x8xbf16>, vector<8x8x8xf32> -> vector<8x8x8xf32>
    "tpu.trace_stop"() : () -> ()
    %54 = vector.extract_strided_slice %53 {offsets = [0, 0, 0], sizes = [2, 8, 8], strides = [1, 1, 1]} : vector<8x8x8xf32> to vector<2x8x8xf32>
    %55 = vector.shape_cast %54 : vector<2x8x8xf32> to vector<16x8xf32>
    %56 = vector.extract_strided_slice %53 {offsets = [2, 0, 0], sizes = [2, 8, 8], strides = [1, 1, 1]} : vector<8x8x8xf32> to vector<2x8x8xf32>
    %57 = vector.shape_cast %56 : vector<2x8x8xf32> to vector<16x8xf32>
    %58 = vector.extract_strided_slice %53 {offsets = [4, 0, 0], sizes = [2, 8, 8], strides = [1, 1, 1]} : vector<8x8x8xf32> to vector<2x8x8xf32>
    %59 = vector.shape_cast %58 : vector<2x8x8xf32> to vector<16x8xf32>
    %60 = vector.extract_strided_slice %53 {offsets = [6, 0, 0], sizes = [2, 8, 8], strides = [1, 1, 1]} : vector<8x8x8xf32> to vector<2x8x8xf32>
    %61 = vector.shape_cast %60 : vector<2x8x8xf32> to vector<16x8xf32>
    %62 = tpu.concatenate %55, %57, %59, %61 in 1 : vector<16x8xf32>, vector<16x8xf32>, vector<16x8xf32>, vector<16x8xf32> -> vector<16x32xf32>
    %c0_10 = arith.constant 0 : index
    %c0_11 = arith.constant 0 : index
    %63 = vector.load %arg4[%c0_10, %c0_11] : memref<32x32xbf16, #tpu.memory_space<vmem>>, vector<32x32xbf16>
    %64 = arith.truncf %62 : vector<16x32xf32> to vector<16x32xbf16>
    "tpu.trace_start"() <{level = 10 : i32, message = "ed,ld->el"}> : () -> ()
    %cst_12 = arith.constant dense<0.000000e+00> : vector<32x16xf32>
    %65 = tpu.matmul %63, %64, %cst_12 {dimension_numbers = #tpu.dot_dimension_numbers<[1], [1], [0], [0], [0, 0, 1, 0], [], []>} : vector<32x32xbf16>, vector<16x32xbf16>, vector<32x16xf32> -> vector<32x16xf32>
    "tpu.trace_stop"() : () -> ()
    %c0_13 = arith.constant 0 : index
    %c0_14 = arith.constant 0 : index
    %66 = vector.load %arg5[%c0_13, %c0_14] : memref<32x1xf32, #tpu.memory_space<vmem>>, vector<32x1xf32>
    %67 = vector.broadcast %66 : vector<32x1xf32> to vector<32x16xf32>
    %68 = arith.addf %65, %67 : vector<32x16xf32>
    %69 = arith.addf %2, %68 : vector<32x16xf32>
    %cst_15 = arith.constant dense<0.000000e+00> : vector<32xf32>
    %70 = vector.multi_reduction <add>, %69, %cst_15 [1] : vector<32x16xf32> to vector<32xf32>
    %71 = vector.shape_cast %70 : vector<32xf32> to vector<32x1xf32>
    %cst_16 = arith.constant 1.600000e+01 : f32
    %72 = vector.broadcast %cst_16 : f32 to vector<32x1xf32>
    %73 = arith.divf %71, %72 : vector<32x1xf32>
    %74 = vector.broadcast %73 : vector<32x1xf32> to vector<32x16xf32>
    %75 = arith.subf %69, %74 : vector<32x16xf32>
    %76 = arith.mulf %75, %75 : vector<32x16xf32>
    %cst_17 = arith.constant dense<0.000000e+00> : vector<32xf32>
    %77 = vector.multi_reduction <add>, %76, %cst_17 [1] : vector<32x16xf32> to vector<32xf32>
    %78 = vector.shape_cast %77 : vector<32xf32> to vector<32x1xf32>
    %cst_18 = arith.constant 1.600000e+01 : f32
    %79 = vector.broadcast %cst_18 : f32 to vector<32x1xf32>
    %80 = arith.divf %78, %79 : vector<32x1xf32>
    %81 = vector.broadcast %73 : vector<32x1xf32> to vector<32x16xf32>
    %82 = arith.subf %69, %81 : vector<32x16xf32>
    %cst_19 = arith.constant 9.99999974E-6 : f32
    %83 = vector.broadcast %cst_19 : f32 to vector<32x1xf32>
    %84 = arith.addf %80, %83 : vector<32x1xf32>
    %85 = math.rsqrt %84 : vector<32x1xf32>
    %86 = vector.broadcast %85 : vector<32x1xf32> to vector<32x16xf32>
    %87 = arith.mulf %82, %86 : vector<32x16xf32>
    %c0_20 = arith.constant 0 : index
    %c0_21 = arith.constant 0 : index
    %88 = vector.load %arg6[%c0_20, %c0_21] : memref<64x32xbf16, #tpu.memory_space<vmem>>, vector<64x32xbf16>
    %89 = arith.truncf %87 : vector<32x16xf32> to vector<32x16xbf16>
    "tpu.trace_start"() <{level = 10 : i32, message = "fd,dl->fl"}> : () -> ()
    %cst_22 = arith.constant dense<0.000000e+00> : vector<64x16xf32>
    %90 = tpu.matmul %88, %89, %cst_22 {dimension_numbers = #tpu.dot_dimension_numbers<[1], [0], [0], [1], [0, 0, 1, 1], [], []>} : vector<64x32xbf16>, vector<32x16xbf16>, vector<64x16xf32> -> vector<64x16xf32>
    "tpu.trace_stop"() : () -> ()
    %c0_23 = arith.constant 0 : index
    %c0_24 = arith.constant 0 : index
    %91 = vector.load %arg7[%c0_23, %c0_24] : memref<64x1xf32, #tpu.memory_space<vmem>>, vector<64x1xf32>
    %92 = vector.broadcast %91 : vector<64x1xf32> to vector<64x16xf32>
    %93 = arith.addf %90, %92 : vector<64x16xf32>
    %cst_25 = arith.constant 0.000000e+00 : f32
    %94 = vector.broadcast %cst_25 : f32 to vector<64x16xf32>
    %95 = arith.maximumf %93, %94 : vector<64x16xf32>
    %c0_26 = arith.constant 0 : index
    %c0_27 = arith.constant 0 : index
    %96 = vector.load %arg8[%c0_26, %c0_27] : memref<32x64xbf16, #tpu.memory_space<vmem>>, vector<32x64xbf16>
    %97 = arith.truncf %95 : vector<64x16xf32> to vector<64x16xbf16>
    "tpu.trace_start"() <{level = 10 : i32, message = "ef,fl->el"}> : () -> ()
    %cst_28 = arith.constant dense<0.000000e+00> : vector<32x16xf32>
    %98 = tpu.matmul %96, %97, %cst_28 {dimension_numbers = #tpu.dot_dimension_numbers<[1], [0], [0], [1], [0, 0, 1, 1], [], []>} : vector<32x64xbf16>, vector<64x16xbf16>, vector<32x16xf32> -> vector<32x16xf32>
    "tpu.trace_stop"() : () -> ()
    %c0_29 = arith.constant 0 : index
    %c0_30 = arith.constant 0 : index
    %99 = vector.load %arg9[%c0_29, %c0_30] : memref<32x1xf32, #tpu.memory_space<vmem>>, vector<32x1xf32>
    %100 = vector.broadcast %99 : vector<32x1xf32> to vector<32x16xf32>
    %101 = arith.addf %98, %100 : vector<32x16xf32>
    %102 = arith.addf %87, %101 : vector<32x16xf32>
    %cst_31 = arith.constant dense<0.000000e+00> : vector<32xf32>
    %103 = vector.multi_reduction <add>, %102, %cst_31 [1] : vector<32x16xf32> to vector<32xf32>
    %104 = vector.shape_cast %103 : vector<32xf32> to vector<32x1xf32>
    %cst_32 = arith.constant 1.600000e+01 : f32
    %105 = vector.broadcast %cst_32 : f32 to vector<32x1xf32>
    %106 = arith.divf %104, %105 : vector<32x1xf32>
    %107 = vector.broadcast %106 : vector<32x1xf32> to vector<32x16xf32>
    %108 = arith.subf %102, %107 : vector<32x16xf32>
    %109 = arith.mulf %108, %108 : vector<32x16xf32>
    %cst_33 = arith.constant dense<0.000000e+00> : vector<32xf32>
    %110 = vector.multi_reduction <add>, %109, %cst_33 [1] : vector<32x16xf32> to vector<32xf32>
    %111 = vector.shape_cast %110 : vector<32xf32> to vector<32x1xf32>
    %cst_34 = arith.constant 1.600000e+01 : f32
    %112 = vector.broadcast %cst_34 : f32 to vector<32x1xf32>
    %113 = arith.divf %111, %112 : vector<32x1xf32>
    %114 = vector.broadcast %106 : vector<32x1xf32> to vector<32x16xf32>
    %115 = arith.subf %102, %114 : vector<32x16xf32>
    %cst_35 = arith.constant 9.99999974E-6 : f32
    %116 = vector.broadcast %cst_35 : f32 to vector<32x1xf32>
    %117 = arith.addf %113, %116 : vector<32x1xf32>
    %118 = math.rsqrt %117 : vector<32x1xf32>
    %119 = vector.broadcast %118 : vector<32x1xf32> to vector<32x16xf32>
    %120 = arith.mulf %115, %119 : vector<32x16xf32>
    %121 = arith.truncf %120 : vector<32x16xf32> to vector<32x16xbf16>
    %c0_36 = arith.constant 0 : index
    %c0_37 = arith.constant 0 : index
    %c0_38 = arith.constant 0 : index
    %122 = vector.load %arg10[%c0_36, %c0_37, %c0_38] : memref<1x32x16xbf16, #tpu.memory_space<vmem>>, vector<1x32x16xbf16>
    %123 = vector.shape_cast %122 : vector<1x32x16xbf16> to vector<32x16xbf16>
    %124 = vector.shape_cast %121 : vector<32x16xbf16> to vector<1x32x16xbf16>
    tpu.vector_store %arg10[%c0_36, %c0_37, %c0_38], %124 {strides = array<i32>} : memref<1x32x16xbf16, #tpu.memory_space<vmem>>, vector<1x32x16xbf16>,
    return
  }
  func.func @transform_0(%arg0: i32) -> (i32, i32, i32) {
    %c0_i32 = arith.constant 0 : i32
    %c0_i32_0 = arith.constant 0 : i32
    %c0_i32_1 = arith.constant 0 : i32
    return %arg0, %c0_i32, %c0_i32_0 : i32, i32, i32
  }
  func.func @transform_1(%arg0: i32) -> (i32, i32) {
    %c0_i32 = arith.constant 0 : i32
    %c0_i32_0 = arith.constant 0 : i32
    %c0_i32_1 = arith.constant 0 : i32
    return %c0_i32, %c0_i32_0 : i32, i32
  }
  func.func @transform_2(%arg0: i32) -> (i32, i32) {
    %c0_i32 = arith.constant 0 : i32
    %c0_i32_0 = arith.constant 0 : i32
    %c0_i32_1 = arith.constant 0 : i32
    return %c0_i32, %c0_i32_0 : i32, i32
  }
  func.func @transform_3(%arg0: i32) -> (i32, i32) {
    %c0_i32 = arith.constant 0 : i32
    %c0_i32_0 = arith.constant 0 : i32
    %c0_i32_1 = arith.constant 0 : i32
    return %c0_i32, %c0_i32_0 : i32, i32
  }
  func.func @transform_4(%arg0: i32) -> (i32, i32) {
    %c0_i32 = arith.constant 0 : i32
    %c0_i32_0 = arith.constant 0 : i32
    %c0_i32_1 = arith.constant 0 : i32
    return %c0_i32, %c0_i32_0 : i32, i32
  }
  func.func @transform_5(%arg0: i32) -> (i32, i32) {
    %c0_i32 = arith.constant 0 : i32
    %c0_i32_0 = arith.constant 0 : i32
    %c0_i32_1 = arith.constant 0 : i32
    return %c0_i32, %c0_i32_0 : i32, i32
  }
  func.func @transform_6(%arg0: i32) -> (i32, i32) {
    %c0_i32 = arith.constant 0 : i32
    %c0_i32_0 = arith.constant 0 : i32
    %c0_i32_1 = arith.constant 0 : i32
    return %c0_i32, %c0_i32_0 : i32, i32
  }
  func.func @transform_7(%arg0: i32) -> (i32, i32) {
    %c0_i32 = arith.constant 0 : i32
    %c0_i32_0 = arith.constant 0 : i32
    %c0_i32_1 = arith.constant 0 : i32
    return %c0_i32, %c0_i32_0 : i32, i32
  }
  func.func @transform_8(%arg0: i32) -> (i32, i32) {
    %c0_i32 = arith.constant 0 : i32
    %c0_i32_0 = arith.constant 0 : i32
    %c0_i32_1 = arith.constant 0 : i32
    return %c0_i32, %c0_i32_0 : i32, i32
  }
  func.func @transform_9(%arg0: i32) -> (i32, i32, i32) {
    %c0_i32 = arith.constant 0 : i32
    %c0_i32_0 = arith.constant 0 : i32
    %c0_i32_1 = arith.constant 0 : i32
    return %arg0, %c0_i32, %c0_i32_0 : i32, i32, i32
  }
}

</mosaic_0001>

<bundles_post_ra>
// kernel: tpu_custom_call.1
= control target key start
LH: loop header
LB: loop body
LE: loop exit
PB: predicated region body
PF: predicated region fallthrough
CT: control target
= control target key end

     0   :  { %s1696_s30 = smov 0   ;;  %s2016_s0 = inlined_call_operand.vmem [shape: bf16[2,32,16], index: 0, kind: input, shape index: {}]   ;;  %s2017_s1 = inlined_call_operand.vmem [shape: bf16[32,96], index: 1, kind: input, shape index: {}]   ;;  %s2018_s2 = inlined_call_operand.vmem [shape: f32[1,96], index: 2, kind: input, shape index: {}]   ;;  %s2019_s3 = inlined_call_operand.vmem [shape: bf16[32,32], index: 3, kind: input, shape index: {}]   ;;  %s2020_s4 = inlined_call_operand.vmem [shape: f32[32,1], index: 4, kind: input, shape index: {}]   ;;  %s2021_s5 = inlined_call_operand.vmem [shape: bf16[64,32], index: 5, kind: input, shape index: {}]   ;;  %s2022_s6 = inlined_call_operand.vmem [shape: f32[64,1], index: 6, kind: input, shape index: {}]   ;;  %s2023_s7 = inlined_call_operand.vmem [shape: bf16[32,64], index: 7, kind: input, shape index: {}]   ;;  %s2024_s8 = inlined_call_operand.vmem [shape: f32[32,1], index: 8, kind: input, shape index: {}]   ;;  %s2025_s9 = inlined_call_operand.vmem [shape: bf16[2,32,16], index: 9, kind: output, shape index: {}]  }
   0x1 LB: > { %s1443_s10 = sadd.s32 4294967295, %s1634_s30   ;;  %p1447_p0 = scmp.ge.s32.totalorder %s1634_s30, 1  ;;  %s1634_s30 = sphi %s1696_s30, %s19_s30  }
   0x2   : > { %p287_p1 = scmp.lt.s32.totalorder %s1634_s30, 3 }
   0x4   : > { %p288_p2 = pnand %p1447_p0, %p287_p1 }
   0x5   : > { %p323_p3 = scmp.lt.s32.totalorder (!%p288_p2), %s1443_s10, 1  ;;  %s1636_s21 = smov (!%p288_p2), 120  }
   0x6   : > { %291 = sbr.rel (%p288_p2) target bundleno = 2359 (0x937), region = 56  ;;  %s1637_s22 = smov (!%p288_p2), 112  }
   0x7   : > { %s1638_s23 = smov (!%p288_p2), 96   ;;  %s1639_s24 = smov (!%p288_p2), 104  }
   0x8   : > { %s1640_s25 = smov (!%p288_p2), 64   ;;  %s1641_s26 = smov (!%p288_p2), 8  }
   0x9   : > { %s1642_s27 = smov (!%p288_p2), 16   ;;  %s1643_s28 = smov (!%p288_p2), 24  }
   0xb   : > { %v1532_v0 = vld [vmem:[%s2017_s1 + $0x8] sm:$0xff]  ;;  %s2027_s10 = smov (!%p323_p3, %s1443_s10), 1  ;;  %v1531_v1 = vld [vmem:[%s2017_s1] sm:$0xff]  ;;  %vm390_vm0 = vcmask 261120   ;;  %vm441_vm1 = vcmask 64512   ;;  %vm730_vm2 = vcmask 1043456  }
   0xc   : > { %400 = vmatpush.bf16.msra.mxu0 %v1532_v0  ;;  %s1527_s15 = sshll.u32 %s2027_s10, 4  ;;  %v1577_v5 = vld [vmem:[%s2018_s2] ss:$0 sm:$0xff]  ;;  %vm920_vm3 = vcmask 130048   ;;  %vm923_vm4 = vcmask 195584  }
   0xd   : > { %s1718_s18 = scalar_lea.vmem %s2016_s0, %s1527_s15 }
   0xe   : > { %v1529_v2 = vld [vmem:[%s1718_s18] sm:$0xff]  ;;  %v1530_v3 = vld [vmem:[%s1718_s18 + $0x8] sm:$0xff] }
   0xf   : > { %362 = vxpose.xlu0.c.b16.start [1/2] (short) (narrow) %v1529_v2, 16 }
  0x10   : > { %401 = vmatpush.bf16.msra.mxu0 %v1531_v1 }
  0x1f   : > { %363 = vxpose.xlu0.c.b16.end [2/2] (short) (narrow) %v1530_v3, 16 }
  0xbb   : > { %v370_v4 = vpop.trf.xlu0 }
  0xbc   : > { %1468 = vmatmul.msk.bf16.vlgmr.msra.gmra.mxu0 %vm390_vm0, %v370_v4 }
 0x139   : > { %v403_v6 = vpop.f32.mrf.mxu0 }
 0x13a   : > { %v404_v7 = vadd.f32 %v1577_v5, %v403_v6 }
 0x13c   : > { %410 = vrot.lane.b32.xlu1 %v404_v7, %s1636_s21  ;;  %v428_v13 = vpack.c.bf16 %v404_v7, %v404_v7 }
 0x13e   : > { %v437_v14 = vunpack.c.l.b16 %v428_v13 }
 0x140   : > { %v1730_v15 = vpack.c.b16 %v437_v14, %v437_v14 }
 0x141   : > { %v405_v8 = vpop.f32.mrf.mxu0 }
 0x142   : > { %v406_v9 = vadd.f32 %v1577_v5, %v405_v8 }
 0x144   : > { %418 = vrot.lane.b32.xlu2 %v406_v9, %s1637_s22  ;;  %412 = vrot.lane.b32.xlu1 %v406_v9, %s1636_s21  ;;  %v429_v10 = vpack.c.bf16 %v406_v9, %v406_v9 }
 0x146   : > { %v462_v11 = vunpack.c.l.b16 %v429_v10 }
 0x148   : > { %v1726_v12 = vpack.c.b16 %v462_v11, %v462_v11 }
 0x14a   : > { %464 = vrot.lane.b32.xlu0 %v1726_v12, %s1638_s23 }
 0x14c   : > { %422 = vrot.lane.b32.xlu2 %v404_v7, %s1639_s24  ;;  %416 = vrot.lane.b32.xlu1 %v404_v7, %s1637_s22 }
 0x154   : > { %424 = vrot.lane.b32.xlu2 %v406_v9, %s1639_s24 }
 0x15c   : > { %439 = vrot.lane.b32.xlu2 %v1730_v15, %s1638_s23 }
 0x19e   : > { %v419_v16 = vpop.permute.xlu2 %418 }
 0x19f   : > { %v433_v17 = vpack.c.bf16 %v419_v16, %v419_v16 }
 0x1a1   : > { %v558_v18 = vunpack.c.l.b16 %v433_v17 }
 0x1a3   : > { %v1734_v19 = vpack.c.b16 %v558_v18, %v558_v18 }
 0x1a5   : > { %560 = vrot.lane.b32.xlu2 %v1734_v19, %s1638_s23 }
 0x1a6   : > { %v423_v20 = vpop.permute.xlu2 %422 }
 0x1a7   : > { %v434_v31 = vpack.c.bf16 %v423_v20, %v423_v20 }
 0x1a9   : > { %v582_v36 = vunpack.c.l.b16 %v434_v31 }
 0x1ab   : > { %v1745_v39 = vpack.c.b16 %v582_v36, %v582_v36 }
 0x1ae   : > { %v425_v21 = vpop.permute.xlu2 %424  ;;  %v411_v22 = vpop.permute.xlu1 %410 }
 0x1af   : > { %v430_v23 = vpack.c.bf16 %v411_v22, %v411_v22  ;;  %v435_v40 = vpack.c.bf16 %v425_v21, %v425_v21 }
 0x1b1   : > { %v486_v24 = vunpack.c.l.b16 %v430_v23  ;;  %v606_v42 = vunpack.c.l.b16 %v435_v40 }
 0x1b3   : > { %v487_v25 = vpack.c.b16 %v486_v24, %v486_v24  ;;  %v1754_v43 = vpack.c.b16 %v606_v42, %v606_v42 }
 0x1b5   : > { %768 = vrot.lane.b32.xlu0 %v487_v25, %s1640_s25  ;;  %488 = vrot.lane.b32.xlu1 %v487_v25, %s1638_s23 }
 0x1b6   : > { %v413_v26 = vpop.permute.xlu1 %412  ;;  %v440_v27 = vpop.permute.xlu2 %439 }
 0x1b7   : > { %v431_v28 = vpack.c.bf16 %v413_v26, %v413_v26  ;;  %v446_v29 = vsel %vm441_vm1, %v440_v27, 0 }
 0x1b8   : > { %455 = vmatpush.bf16.xpose.msra.mxu1 %v446_v29 }
 0x1b9   : > { %v510_v30 = vunpack.c.l.b16 %v431_v28 }
 0x1bb   : > { %v511_v32 = vpack.c.b16 %v510_v30, %v510_v30 }
 0x1bc   : > { %v465_v33 = vpop.permute.xlu0 %464 }
 0x1bd   : > { %789 = vrot.lane.b32.xlu0 %v511_v32, %s1640_s25  ;;  %512 = vrot.lane.b32.xlu1 %v511_v32, %s1638_s23  ;;  %v470_v34 = vsel %vm441_vm1, %v465_v33, 0 }
 0x1be   : > { %479 = vmatpush.bf16.xpose.msrb.mxu0 %v470_v34  ;;  %v417_v35 = vpop.permute.xlu1 %416 }
 0x1bf   : > { %v432_v37 = vpack.c.bf16 %v417_v35, %v417_v35  ;;  %1469 = vmatmul.msk.bf16.vlgmr.msra.gmra.mxu1 %vm441_vm1, %v428_v13 }
 0x1c1   : > { %v534_v38 = vunpack.c.l.b16 %v432_v37 }
 0x1c3   : > { %v1747_v41 = vpack.c.b16 %v534_v38, %v534_v38 }
 0x1c5   : > { %1470 = vmatmul.msk.bf16.vlgmr.msrb.gmra.mxu0 %vm441_vm1, %v429_v10  ;;  %584 = vrot.lane.b32.xlu1 %v1745_v39, %s1638_s23 }
 0x1c6   : > { %536 = vrot.lane.b32.xlu2 %v1747_v41, %s1638_s23 }
 0x1cd   : > { %608 = vrot.lane.b32.xlu1 %v1754_v43, %s1638_s23 }
 0x1ff   : > { %v561_v44 = vpop.permute.xlu2 %560 }
 0x200   : > { %v566_v45 = vsel %vm441_vm1, %v561_v44, 0 }
 0x201   : > { %575 = vmatpush.bf16.xpose.msra.mxu2 %v566_v45 }
 0x208   : > { %1474 = vmatmul.msk.bf16.vlgmr.msra.gmra.mxu2 %vm441_vm1, %v433_v17 }
 0x220   : > { %v537_v46 = vpop.permute.xlu2 %536 }
 0x221   : > { %v542_v47 = vsel %vm441_vm1, %v537_v46, 0 }
 0x222   : > { %551 = vmatpush.bf16.xpose.msrb.mxu1 %v542_v47 }
 0x227   : > { %v489_v48 = vpop.permute.xlu1 %488  ;;  %v769_v52 = vpop.permute.xlu0 %768 }
 0x228   : > { %v494_v49 = vsel %vm441_vm1, %v489_v48, 0  ;;  %v774_v55 = vsel %vm730_vm2, %v769_v52, 0 }
 0x229   : > { %1473 = vmatmul.msk.bf16.vlgmr.msrb.gmra.mxu1 %vm441_vm1, %v432_v37  ;;  %503 = vmatpush.bf16.xpose.msra.mxu3 %v494_v49 }
 0x22f   : > { %v513_v50 = vpop.permute.xlu1 %512  ;;  %v790_v58 = vpop.permute.xlu0 %789 }
 0x230   : > { %v518_v51 = vsel %vm441_vm1, %v513_v50, 0  ;;  %1471 = vmatmul.msk.bf16.vlgmr.msra.gmra.mxu3 %vm441_vm1, %v430_v23  ;;  %v795_v61 = vsel %vm730_vm2, %v790_v58, 0 }
 0x231   : > { %527 = vmatpush.bf16.xpose.msra.mxu0 %v518_v51 }
 0x237   : > { %v585_v53 = vpop.permute.xlu1 %584 }
 0x238   : > { %1472 = vmatmul.msk.bf16.vlgmr.msra.gmra.mxu0 %vm441_vm1, %v431_v28  ;;  %v590_v54 = vsel %vm441_vm1, %v585_v53, 0 }
 0x239   : > { %599 = vmatpush.bf16.xpose.msrb.mxu3 %v590_v54 }
 0x23c   : > { %v457_v56 = vpop.f32.mrf.mxu1 }
 0x23d   : > { %v629_v57 = vsel %vm441_vm1, %v457_v56, -inf }
 0x23e   : > { %630 = vmax.xlane.f32.xlu2 %v629_v57 }
 0x23f   : > { %v609_v59 = vpop.permute.xlu1 %608 }
 0x240   : > { %v614_v60 = vsel %vm441_vm1, %v609_v59, 0  ;;  %1475 = vmatmul.msk.bf16.vlgmr.msrb.gmra.mxu3 %vm441_vm1, %v434_v31 }
 0x241   : > { %783 = vmatpush.bf16.msra.mxu3 %v774_v55  ;;  %623 = vmatpush.bf16.xpose.msrb.mxu0 %v614_v60 }
 0x242   : > { %v481_v62 = vpop.f32.mrf.mxu0 }
 0x243   : > { %v632_v0 = vsel %vm441_vm1, %v481_v62, -inf }
 0x244   : > { %v459_v63 = vpop.f32.mrf.mxu1 }
 0x246   : > { %633 = vmax.xlane.f32.xlu2 %v632_v0 }
 0x248   : > { %1476 = vmatmul.msk.bf16.vlgmr.msrb.gmra.mxu0 %vm441_vm1, %v435_v40 }
 0x249   : > { %804 = vmatpush.bf16.msra.mxu0 %v795_v61 }
 0x24a   : > { %v483_v1 = vpop.f32.mrf.mxu0 }
 0x28b   : > { %v1774_v2 = vpop.f32.mrf.mxu2 }
 0x28c   : > { %v644_v23 = vsel %vm441_vm1, %v1774_v2, -inf }
 0x293   : > { %v579_v3 = vpop.f32.mrf.mxu2 }
 0x2a6   : > { %v553_v4 = vpop.f32.mrf.mxu1 }
 0x2a7   : > { %v641_v5 = vsel %vm441_vm1, %v553_v4, -inf }
 0x2a8   : > { %642 = vmax.xlane.f32.xlu1 %v641_v5 }
 0x2ae   : > { %v555_v6 = vpop.f32.mrf.mxu1 }
 0x2b1   : > { %v631_v7 = vpop.xlane.xlu2 %630 }
 0x2b2   : > { %v653_v8 = vsub.f32 %v457_v56, %v631_v7 }
 0x2b3   : > { %v505_v9 = vpop.f32.mrf.mxu3 }
 0x2b4   : > { %v661_v10 = vmul.f32 1.442695, %v653_v8  ;;  %v635_v11 = vsel %vm441_vm1, %v505_v9, -inf }
 0x2b5   : > { %v529_v13 = vpop.f32.mrf.mxu0  ;;  %636 = vmax.xlane.f32.xlu1 %v635_v11 }
 0x2b6   : > { %1578 = vpow2.f32 %v661_v10  ;;  %v638_v14 = vsel %vm441_vm1, %v529_v13, -inf }
 0x2b7   : > { %639 = vmax.xlane.f32.xlu2 %v638_v14 }
 0x2b9   : > { %v634_v26 = vpop.xlane.xlu2 %633 }
 0x2ba   : > { %v654_v27 = vsub.f32 %v481_v62, %v634_v26 }
 0x2bb   : > { %v507_v16 = vpop.f32.mrf.mxu3 }
 0x2bc   : > { %v1579_v17 = vpop.eup %1578  ;;  %v663_v29 = vmul.f32 1.442695, %v654_v27 }
 0x2bd   : > { %v531_v18 = vpop.f32.mrf.mxu0  ;;  %v677_v20 = vsel %vm441_vm1, %v1579_v17, 0.0 }
 0x2be   : > { %678 = vadd.xlane.f32.xlu1 %v677_v20  ;;  %1580 = vpow2.f32 %v663_v29 }
 0x2c3   : > { %v1780_v21 = vpop.f32.mrf.mxu3 }
 0x2c4   : > { %v647_v28 = vsel %vm441_vm1, %v1780_v21, -inf  ;;  %v1581_v31 = vpop.eup %1580 }
 0x2c5   : > { %v1782_v22 = vpop.f32.mrf.mxu0  ;;  %v680_v32 = vsel %vm441_vm1, %v1581_v31, 0.0 }
 0x2c6   : > { %645 = vmax.xlane.f32.xlu1 %v644_v23  ;;  %v650_v30 = vsel %vm441_vm1, %v1782_v22, -inf }
 0x2cb   : > { %v603_v24 = vpop.f32.mrf.mxu3 }
 0x2cd   : > { %v627_v25 = vpop.f32.mrf.mxu0 }
 0x2cf   : > { %725 = vrot.lane.b32.xlu2 %v1730_v15, %s1640_s25 }
 0x2df   : > { %747 = vrot.lane.b32.xlu1 %v1726_v12, %s1640_s25 }
 0x2f8   : > { %648 = vmax.xlane.f32.xlu2 %v647_v28 }
 0x300   : > { %651 = vmax.xlane.f32.xlu2 %v650_v30 }
 0x309   : > { %681 = vadd.xlane.f32.xlu1 %v680_v32 }
 0x31b   : > { %v643_v15 = vpop.xlane.xlu1 %642 }
 0x31c   : > { %v657_v33 = vsub.f32 %v553_v4, %v643_v15 }
 0x31e   : > { %v669_v34 = vmul.f32 1.442695, %v657_v33 }
 0x320   : > { %1582 = vpow2.f32 %v669_v34 }
 0x326   : > { %v1795_v12 = vpop.eup %1582 }
 0x327   : > { %v689_v35 = vsel %vm441_vm1, %v1795_v12, 0.0 }
 0x328   : > { %690 = vadd.xlane.f32.xlu2 %v689_v35  ;;  %v637_v36 = vpop.xlane.xlu1 %636 }
 0x329   : > { %v655_v37 = vsub.f32 %v505_v9, %v637_v36 }
 0x32a   : > { %v640_v38 = vpop.xlane.xlu2 %639 }
 0x32b   : > { %v665_v40 = vmul.f32 1.442695, %v655_v37  ;;  %v656_v42 = vsub.f32 %v529_v13, %v640_v38 }
 0x32d   : > { %1584 = vpow2.f32 %v665_v40  ;;  %v667_v44 = vmul.f32 1.442695, %v656_v42 }
 0x331   : > { %v679_v45 = vpop.xlane.xlu1 %678 }
 0x332   : > { %1586 = vrcp.f32 %v679_v45  ;;  %v726_v46 = vpop.permute.xlu2 %725 }
 0x333   : > { %v1585_v47 = vpop.eup %1584  ;;  %1588 = vpow2.f32 %v667_v44  ;;  %v732_v48 = vsel %vm730_vm2, %v726_v46, 0 }
 0x334   : > { %741 = vmatpush.bf16.msra.mxu1 %v732_v48  ;;  %v683_v49 = vsel %vm441_vm1, %v1585_v47, 0.0 }
 0x335   : > { %684 = vadd.xlane.f32.xlu2 %v683_v49 }
 0x338   : > { %v1587_v50 = vpop.eup %1586 }
 0x339   : > { %v1589_v51 = vpop.eup %1588  ;;  %v709_v52 = vmul.f32 %v1587_v50, %v1579_v17  ;;  %v646_v53 = vpop.xlane.xlu1 %645 }
 0x33a   : > { %v658_v54 = vsub.f32 %v1774_v2, %v646_v53  ;;  %v686_v57 = vsel %vm441_vm1, %v1589_v51, 0.0 }
 0x33b   : > { %v717_v55 = vpack.c.bf16 %v709_v52, %v709_v52 }
 0x33c   : > { %v671_v56 = vmul.f32 1.442695, %v658_v54 }
 0x33d   : > { %687 = vadd.xlane.f32.xlu2 %v686_v57  ;;  %1477 = vmatmul.msk.bf16.vlgmr.msra.gmra.mxu1 %vm441_vm1, %v717_v55 }
 0x33e   : > { %1590 = vpow2.f32 %v671_v56 }
 0x344   : > { %v1804_v58 = vpop.eup %1590 }
 0x345   : > { %v692_v59 = vsel %vm441_vm1, %v1804_v58, 0.0 }
 0x346   : > { %693 = vadd.xlane.f32.xlu0 %v692_v59 }
 0x351   : > { %v748_v60 = vpop.permute.xlu1 %747 }
 0x352   : > { %v753_v61 = vsel %vm730_vm2, %v748_v60, 0 }
 0x353   : > { %762 = vmatpush.bf16.msrb.mxu2 %v753_v61 }
 0x355   : > { %810 = vrot.lane.b32.xlu2 %v1747_v41, %s1640_s25 }
 0x35a   : > { %852 = vrot.lane.b32.xlu0 %v1745_v39, %s1640_s25 }
 0x36b   : > { %v649_v62 = vpop.xlane.xlu2 %648 }
 0x36c   : > { %v659_v63 = vsub.f32 %v1780_v21, %v649_v62 }
 0x36e   : > { %v673_v0 = vmul.f32 1.442695, %v659_v63  ;;  %v933_v63 = vld [vmem:[%s2020_s4 + $0x10] sm:$0xff] }
 0x370   : > { %1592 = vpow2.f32 %v673_v0  ;;  %v931_v0 = vld [vmem:[%s2020_s4] sm:$0xff] }
 0x373   : > { %v652_v1 = vpop.xlane.xlu2 %651 }
 0x374   : > { %v660_v2 = vsub.f32 %v1782_v22, %v652_v1  ;;  %v1644_v1 = vmov 0  }
 0x375   : > { %1574 = vset.pattern.permute.xlu1 %v1644_v1  ;;  %1576 = vset.pattern.permute.xlu0 %v1644_v1 }
 0x376   : > { %v1593_v3 = vpop.eup %1592  ;;  %v675_v4 = vmul.f32 1.442695, %v660_v2  ;;  %1575 = vset.pattern.permute.xlu2 %v1644_v1 }
 0x377   : > { %v695_v5 = vsel %vm441_vm1, %v1593_v3, 0.0 }
 0x378   : > { %696 = vadd.xlane.f32.xlu1 %v695_v5  ;;  %1594 = vpow2.f32 %v675_v4 }
 0x37c   : > { %v682_v6 = vpop.xlane.xlu1 %681 }
 0x37d   : > { %1596 = vrcp.f32 %v682_v6 }
 0x37e   : > { %v1595_v41 = vpop.eup %1594 }
 0x37f   : > { %v698_v39 = vsel %vm441_vm1, %v1595_v41, 0.0 }
 0x383   : > { %v1597_v7 = vpop.eup %1596 }
 0x384   : > { %v710_v8 = vmul.f32 %v1597_v7, %v1581_v31  ;;  %699 = vadd.xlane.f32.xlu0 %v698_v39  ;;  %v932_v7 = vld [vmem:[%s2020_s4 + $0x8] sm:$0xff]  ;;  %v934_v39 = vld [vmem:[%s2020_s4 + $0x18] sm:$0xff] }
 0x386   : > { %v718_v9 = vpack.c.bf16 %v710_v8, %v710_v8 }
 0x388   : > { %1478 = vmatmul.msk.bf16.vlgmr.msrb.gmra.mxu2 %vm441_vm1, %v718_v9 }
 0x391   : > { %831 = vrot.lane.b32.xlu1 %v1734_v19, %s1640_s25 }
 0x398   : > { %873 = vrot.lane.b32.xlu0 %v1754_v43, %s1640_s25  ;;  %s2000_s25 = scalar_lea.vmem %s2025_s9, %s1527_s15 }
 0x39b   : > { %v691_v10 = vpop.xlane.xlu2 %690 }
 0x3a8   : > { %v685_v11 = vpop.xlane.xlu2 %684 }
 0x3a9   : > { %1598 = vrcp.f32 %v685_v11 }
 0x3aa   : > { %1600 = vrcp.f32 %v691_v10 }
 0x3af   : > { %v1599_v13 = vpop.eup %1598 }
 0x3b0   : > { %v711_v14 = vmul.f32 %v1599_v13, %v1585_v47  ;;  %v688_v16 = vpop.xlane.xlu2 %687  ;;  %v1601_v18 = vpop.eup %1600 }
 0x3b1   : > { %1602 = vrcp.f32 %v688_v16  ;;  %v713_v21 = vmul.f32 %v1601_v18, %v1795_v12 }
 0x3b2   : > { %v719_v17 = vpack.c.bf16 %v711_v14, %v711_v14 }
 0x3b3   : > { %v721_v25 = vpack.c.bf16 %v713_v21, %v713_v21 }
 0x3b4   : > { %1479 = vmatmul.msk.bf16.vlgmr.msra.gmra.mxu3 %vm441_vm1, %v719_v17 }
 0x3b7   : > { %v1603_v20 = vpop.eup %1602 }
 0x3b8   : > { %v712_v22 = vmul.f32 %v1603_v20, %v1589_v51  ;;  %v811_v19 = vpop.permute.xlu2 %810 }
 0x3b9   : > { %v816_v23 = vsel %vm730_vm2, %v811_v19, 0  ;;  %v694_v27 = vpop.xlane.xlu0 %693  ;;  %v1534_v19 = vld [vmem:[%s2019_s3 + $0x8] sm:$0xff] }
 0x3ba   : > { %v720_v43 = vpack.c.bf16 %v712_v22, %v712_v22  ;;  %v1825_v24 = vpop.f32.mrf.mxu1  ;;  %825 = vmatpush.bf16.msrb.mxu1 %v816_v23  ;;  %v1533_v22 = vld [vmem:[%s2019_s3] sm:$0xff] }
 0x3bb   : > { %v334_v23 = vld [vmem:[%s1718_s18] sm:$0xff]  }
 0x3bc   : > { %1480 = vmatmul.msk.bf16.vlgmr.msra.gmra.mxu0 %vm441_vm1, %v720_v43 }
 0x3bd   : > { %1481 = vmatmul.msk.bf16.vlgmr.msrb.gmra.mxu1 %vm441_vm1, %v721_v25 }
 0x3c2   : > { %v745_v26 = vpop.f32.mrf.mxu1 }
 0x3cc   : > { %v853_v28 = vpop.permute.xlu0 %852 }
 0x3cd   : > { %v858_v29 = vsel %vm730_vm2, %v853_v28, 0 }
 0x3ce   : > { %867 = vmatpush.bf16.msrb.mxu3 %v858_v29 }
 0x3eb   : > { %v697_v30 = vpop.xlane.xlu1 %696 }
 0x3ec   : > { %1604 = vrcp.f32 %v697_v30 }
 0x3ed   : > { %1606 = vrcp.f32 %v694_v27 }
 0x3f2   : > { %v1605_v31 = vpop.eup %1604 }
 0x3f3   : > { %v715_v32 = vmul.f32 %v1605_v31, %v1593_v3  ;;  %v1607_v34 = vpop.eup %1606  ;;  %v336_v31 = vld [vmem:[%s1718_s18 + $0x8] sm:$0xff]  }
 0x3f4   : > { %v714_v12 = vmul.f32 %v1607_v34, %v1804_v58 }
 0x3f5   : > { %v723_v15 = vpack.c.bf16 %v715_v32, %v715_v32  ;;  %v340_v32 = vunpack.c.l.bf16 %v336_v31 }
 0x3f6   : > { %v722_v38 = vpack.c.bf16 %v714_v12, %v714_v12 }
 0x3f7   : > { %1483 = vmatmul.msk.bf16.vlgmr.msrb.gmra.mxu3 %vm441_vm1, %v723_v15  ;;  %v700_v33 = vpop.xlane.xlu0 %699 }
 0x3f8   : > { %1608 = vrcp.f32 %v700_v33 }
 0x3fe   : > { %v1609_v37 = vpop.eup %1608 }
 0x3ff   : > { %v716_v40 = vmul.f32 %v1609_v37, %v1595_v41  ;;  %v339_v37 = vunpack.c.h.bf16 %v334_v23 }
 0x401   : > { %v724_v46 = vpack.c.bf16 %v716_v40, %v716_v40  ;;  %v341_v40 = vunpack.c.h.bf16 %v336_v31 }
 0x403   : > { %v832_v35 = vpop.permute.xlu1 %831 }
 0x404   : > { %v837_v36 = vsel %vm730_vm2, %v832_v35, 0 }
 0x405   : > { %846 = vmatpush.bf16.msra.mxu2 %v837_v36 }
 0x408   : > { %1482 = vmatmul.msk.bf16.vlgmr.msra.gmra.mxu2 %vm441_vm1, %v722_v38 }
 0x40a   : > { %v874_v42 = vpop.permute.xlu0 %873 }
 0x40b   : > { %v879_v44 = vsel %vm730_vm2, %v874_v42, 0  ;;  %v764_v45 = vpop.f32.mrf.mxu2 }
 0x40c   : > { %888 = vmatpush.bf16.msrb.mxu0 %v879_v44 }
 0x40f   : > { %1484 = vmatmul.msk.bf16.vlgmr.msrb.gmra.mxu0 %vm441_vm1, %v724_v46 }
 0x413   : > { %v766_v47 = vpop.f32.mrf.mxu2 }
 0x437   : > { %v785_v48 = vpop.f32.mrf.mxu3 }
 0x439   : > { %v806_v49 = vpop.f32.mrf.mxu0 }
 0x43a   : > { %v1559_v50 = vpack.i.bf16 %v806_v49, %v785_v48  ;;  %v827_v51 = vpop.f32.mrf.mxu1  ;;  %v1645_v49 = vmov 16.0  }
 0x43b   : > { %1610 = vrcp.f32 %v1645_v49 }
 0x43c   : > { %1560 = vrot.lane.b32.xlu1 %v1559_v50, %s1641_s26 }
 0x43f   : > { %v787_v52 = vpop.f32.mrf.mxu3 }
 0x441   : > { %v808_v53 = vpop.f32.mrf.mxu0  ;;  %v1611_v50 = vpop.eup %1610 }
 0x442   : > { %v829_v54 = vpop.f32.mrf.mxu1  ;;  %vm1014_vm5 = vweird.f32 %v1611_v50 }
 0x444   : > { %947 = vperm.xlu1 %1574, %v933_v63  }
 0x44c   : > { %942 = vperm.xlu1 %1574, %v932_v7  }
 0x47a   : > { %v869_v55 = vpop.f32.mrf.mxu3 }
 0x482   : > { %v871_v56 = vpop.f32.mrf.mxu3 }
 0x48b   : > { %v848_v57 = vpop.f32.mrf.mxu2 }
 0x48c   : > { %v1564_v58 = vpack.i.bf16 %v848_v57, %v827_v51  ;;  %v890_v59 = vpop.f32.mrf.mxu0  ;;  %v1010_v51 = vmul.f32 16.0, %v1611_v50 }
 0x48d   : > { %v1569_v60 = vpack.i.bf16 %v890_v59, %v869_v55 }
 0x48e   : > { %1565 = vrot.lane.b32.xlu2 %v1564_v58, %s1642_s27  ;;  %v1011_v52 = vsub.f32 1.0, %v1010_v51 }
 0x48f   : > { %1570 = vrot.lane.b32.xlu0 %v1569_v60, %s1643_s28 }
 0x490   : > { %v1012_v53 = vmul.f32 %v1611_v50, %v1011_v52 }
 0x492   : > { %v1013_v54 = vadd.f32 %v1611_v50, %v1012_v53 }
 0x493   : > { %v850_v61 = vpop.f32.mrf.mxu2 }
 0x494   : > { %v892_v62 = vpop.f32.mrf.mxu0  ;;  %v1868_v55 = vsel %vm1014_vm5, %v1611_v50, %v1013_v54 }
 0x496   : > { %952 = vperm.xlu2 %1575, %v934_v39  }
 0x497   : > { %937 = vperm.xlu0 %1576, %v931_v0  }
 0x4ae   : > { %v1561_v2 = vpop.permute.xlu1 %1560 }
 0x4af   : > { %v1563_v4 = vunpack.i.h.bf16 %v1561_v2  ;;  %v1562_v5 = vunpack.i.l.bf16 %v1561_v2 }
 0x4b1   : > { %v919_v9 = vsel %vm441_vm1, %v764_v45, %v1563_v4  ;;  %v918_v10 = vsel %vm441_vm1, %v1825_v24, %v1562_v5  ;;  %v338_v24 = vunpack.c.l.bf16 %v334_v23  ;;  %v1230_v23 = vld [vmem:[%s2024_s8 + $0x18] sm:$0xff] }
 0x4b6   : > { %v948_v29 = vpop.permute.xlu1 %947 }
 0x4be   : > { %v943_v34 = vpop.permute.xlu1 %942 }
 0x4e8   : > { %v1566_v3 = vpop.permute.xlu2 %1565 }
 0x4e9   : > { %v1568_v6 = vunpack.i.h.bf16 %v1566_v3  ;;  %v1567_v41 = vunpack.i.l.bf16 %v1566_v3 }
 0x4eb   : > { %v922_v14 = vsel %vm920_vm3, %v919_v9, %v1568_v6  ;;  %v921_v16 = vsel %vm920_vm3, %v918_v10, %v1567_v41  ;;  %v1109_v6 = vld [vmem:[%s2022_s6 + $0x38] sm:$0xff] }
 0x4f0   : > { %v953_v38 = vpop.permute.xlu2 %952 }
 0x501   : > { %v1571_v8 = vpop.permute.xlu0 %1570 }
 0x502   : > { %v1573_v11 = vunpack.i.h.bf16 %v1571_v8  ;;  %v1572_v13 = vunpack.i.l.bf16 %v1571_v8 }
 0x504   : > { %v924_v17 = vsel %vm923_vm4, %v921_v16, %v1572_v13  ;;  %v925_v18 = vsel %vm923_vm4, %v922_v14, %v1573_v11  ;;  %v1107_v11 = vld [vmem:[%s2022_s6 + $0x28] sm:$0xff]  ;;  %v1102_v13 = vld [vmem:[%s2022_s6] sm:$0xff]  ;;  %v1108_v16 = vld [vmem:[%s2022_s6 + $0x30] sm:$0xff] }
 0x505   : > { %v930_v20 = vpack.c.bf16 %v925_v18, %v924_v17  ;;  %v1228_v14 = vld [vmem:[%s2024_s8 + $0x8] sm:$0xff]  ;;  %v1106_v17 = vld [vmem:[%s2022_s6 + $0x20] sm:$0xff]  ;;  %v1104_v18 = vld [vmem:[%s2022_s6 + $0x10] sm:$0xff] }
 0x507   : > { %v972_v21 = vsel %vm390_vm0, %v930_v20, 0  ;;  %v1105_v20 = vld [vmem:[%s2022_s6 + $0x18] sm:$0xff] }
 0x508   : > { %981 = vmatpush.bf16.xpose.msra.mxu1 %v972_v21  ;;  %v1103_v21 = vld [vmem:[%s2022_s6 + $0x8] sm:$0xff] }
 0x509   : > { %v938_v43 = vpop.permute.xlu0 %937 }
 0x50f   : > { %1493 = vmatmul.msk.bf16.vlgmr.msra.gmra.mxu1 %vm390_vm0, %v1533_v22  ;;  %v1227_v22 = vld [vmem:[%s2024_s8] sm:$0xff] }
 0x51f   : > { %1494 = vmatmul.msk.bf16.gmra.mxu1 %vm390_vm0, %v1534_v19  ;;  %v1229_v19 = vld [vmem:[%s2024_s8 + $0x10] sm:$0xff] }
 0x58c   : > { %v983_v25 = vpop.f32.mrf.mxu1 }
 0x58d   : > { %v984_v26 = vadd.f32 %v983_v25, %v938_v43 }
 0x58f   : > { %v993_v27 = vadd.f32 %v984_v26, %v338_v24 }
 0x591   : > { %v997_v28 = vsel %vm920_vm3, %v993_v27, 0.0 }
 0x592   : > { %998 = vadd.xlane.f32.xlu0 %v997_v28 }
 0x594   : > { %v985_v30 = vpop.f32.mrf.mxu1 }
 0x595   : > { %v986_v35 = vadd.f32 %v985_v30, %v943_v34 }
 0x597   : > { %v994_v45 = vadd.f32 %v986_v35, %v339_v37 }
 0x599   : > { %v1000_v48 = vsel %vm920_vm3, %v994_v45, 0.0 }
 0x59c   : > { %v988_v15 = vpop.f32.mrf.mxu1 }
 0x59d   : > { %v989_v33 = vadd.f32 %v988_v15, %v948_v29 }
 0x59f   : > { %v995_v12 = vadd.f32 %v989_v33, %v340_v32 }
 0x5a1   : > { %v1003_v36 = vsel %vm920_vm3, %v995_v12, 0.0 }
 0x5a2   : > { %1004 = vadd.xlane.f32.xlu2 %v1003_v36 }
 0x5a4   : > { %v990_v42 = vpop.f32.mrf.mxu1 }
 0x5a5   : > { %v991_v44 = vadd.f32 %v990_v42, %v953_v38 }
 0x5a7   : > { %v996_v46 = vadd.f32 %v991_v44, %v341_v40 }
 0x5a9   : > { %v1006_v47 = vsel %vm920_vm3, %v996_v46, 0.0 }
 0x5aa   : > { %1007 = vadd.xlane.f32.xlu1 %v1006_v47  ;;  %1001 = vadd.xlane.f32.xlu2 %v1000_v48 }
 0x605   : > { %v999_v56 = vpop.xlane.xlu0 %998 }
 0x606   : > { %v1016_v57 = vmul.f32 %v1868_v55, %v999_v56 }
 0x608   : > { %v1871_v58 = vsub.f32 %v993_v27, %v1016_v57 }
 0x60a   : > { %v1024_v59 = vmul.f32 %v1871_v58, %v1871_v58 }
 0x60c   : > { %v1028_v60 = vsel %vm920_vm3, %v1024_v59, 0.0 }
 0x60d   : > { %1029 = vadd.xlane.f32.xlu0 %v1028_v60 }
 0x615   : > { %v1005_v61 = vpop.xlane.xlu2 %1004 }
 0x616   : > { %v1018_v62 = vmul.f32 %v1868_v55, %v1005_v61 }
 0x618   : > { %v1877_v63 = vsub.f32 %v995_v12, %v1018_v62 }
 0x61a   : > { %v1026_v0 = vmul.f32 %v1877_v63, %v1877_v63 }
 0x61c   : > { %v1034_v1 = vsel %vm920_vm3, %v1026_v0, 0.0 }
 0x61d   : > { %v1008_v2 = vpop.xlane.xlu1 %1007  ;;  %1035 = vadd.xlane.f32.xlu1 %v1034_v1  ;;  %v1002_v3 = vpop.xlane.xlu2 %1001 }
 0x61e   : > { %v1019_v4 = vmul.f32 %v1868_v55, %v1008_v2  ;;  %v1017_v5 = vmul.f32 %v1868_v55, %v1002_v3 }
 0x620   : > { %v1887_v41 = vsub.f32 %v996_v46, %v1019_v4  ;;  %v1889_v7 = vsub.f32 %v994_v45, %v1017_v5 }
 0x621   : > { %1147 = vperm.xlu0 %1576, %v1109_v6  }
 0x622   : > { %v1027_v39 = vmul.f32 %v1887_v41, %v1887_v41  ;;  %v1025_v8 = vmul.f32 %v1889_v7, %v1889_v7 }
 0x624   : > { %v1037_v9 = vsel %vm920_vm3, %v1027_v39, 0.0  ;;  %v1031_v10 = vsel %vm920_vm3, %v1025_v8, 0.0 }
 0x625   : > { %1038 = vadd.xlane.f32.xlu2 %v1037_v9  ;;  %1032 = vadd.xlane.f32.xlu1 %v1031_v10 }
 0x629   : > { %1137 = vperm.xlu0 %1576, %v1107_v11  }
 0x631   : > { %1112 = vperm.xlu0 %1576, %v1102_v13  }
 0x639   : > { %1238 = vperm.xlu0 %1576, %v1228_v14  }
 0x63d   : > { %1142 = vperm.xlu2 %1575, %v1108_v16  }
 0x63e   : > { %1132 = vperm.xlu1 %1574, %v1106_v17  }
 0x645   : > { %1122 = vperm.xlu2 %1575, %v1104_v18  }
 0x646   : > { %1127 = vperm.xlu1 %1574, %v1105_v20  }
 0x64d   : > { %1117 = vperm.xlu2 %1575, %v1103_v21  }
 0x64e   : > { %1233 = vperm.xlu1 %1574, %v1227_v22  }
 0x655   : > { %1243 = vperm.xlu2 %1575, %v1229_v19  }
 0x656   : > { %1248 = vperm.xlu1 %1574, %v1230_v23  }
 0x680   : > { %v1030_v43 = vpop.xlane.xlu0 %1029 }
 0x681   : > { %v1040_v24 = vmul.f32 %v1030_v43, %v1868_v55 }
 0x683   : > { %v1044_v25 = vadd.f32 1e-05, %v1040_v24 }
 0x685   : > { %1612 = vrsqrt.f32 %v1044_v25  ;;  %vm1054_vm1 = vweird.f32 %v1044_v25 }
 0x68b   : > { %v1613_v15 = vpop.eup %1612 }
 0x68c   : > { %v1049_v36 = vmul.f32 %v1613_v15, %v1044_v25  ;;  %vm1055_vm10 = vweird.f32 %v1613_v15 }
 0x68d   : > { %vm1056_vm2 = vmor %vm1054_vm1, %vm1055_vm10 }
 0x68e   : > { %v1050_v38 = vmul.f32 %v1613_v15, %v1049_v36 }
 0x690   : > { %v1036_v26 = vpop.xlane.xlu1 %1035  ;;  %v1051_v46 = vmul.f32 0.5, %v1050_v38 }
 0x691   : > { %v1042_v27 = vmul.f32 %v1036_v26, %v1868_v55 }
 0x692   : > { %v1052_v52 = vsub.f32 1.5, %v1051_v46 }
 0x693   : > { %v1046_v28 = vadd.f32 1e-05, %v1042_v27  ;;  %v1148_v18 = vpop.permute.xlu0 %1147 }
 0x694   : > { %v1053_v60 = vmul.f32 %v1613_v15, %v1052_v52 }
 0x695   : > { %1614 = vrsqrt.f32 %v1046_v28  ;;  %vm1074_vm8 = vweird.f32 %v1046_v28 }
 0x696   : > { %v1057_v4 = vsel %vm1056_vm2, %v1613_v15, %v1053_v60 }
 0x697   : > { %v1088_v39 = vmul.f32 %v1057_v4, %v1871_v58  ;;  %v1538_v58 = vld [vmem:[%s2021_s5 + $0x18] sm:$0xff] }
 0x698   : > { %v1033_v29 = vpop.xlane.xlu1 %1032  ;;  %v1039_v30 = vpop.xlane.xlu2 %1038 }
 0x699   : > { %v1041_v31 = vmul.f32 %v1033_v29, %v1868_v55  ;;  %v1043_v32 = vmul.f32 %v1039_v30, %v1868_v55 }
 0x69b   : > { %v1615_v33 = vpop.eup %1614  ;;  %v1045_v34 = vadd.f32 1e-05, %v1041_v31  ;;  %v1047_v12 = vadd.f32 1e-05, %v1043_v32  ;;  %v1138_v23 = vpop.permute.xlu0 %1137 }
 0x69c   : > { %v1069_v35 = vmul.f32 %v1615_v33, %v1046_v28  ;;  %vm1075_vm6 = vweird.f32 %v1615_v33 }
 0x69d   : > { %1616 = vrsqrt.f32 %v1045_v34  ;;  %vm1076_vm11 = vmor %vm1074_vm8, %vm1075_vm6  ;;  %vm1064_vm12 = vweird.f32 %v1045_v34  ;;  %vm1084_vm14 = vweird.f32 %v1047_v12  ;;  %vm1383_vm6 = vcmask 125952  }
 0x69e   : > { %v1070_v37 = vmul.f32 %v1615_v33, %v1069_v35  ;;  %1618 = vrsqrt.f32 %v1047_v12 }
 0x6a0   : > { %v1071_v40 = vmul.f32 0.5, %v1070_v37  ;;  %v1143_v17 = vpop.permute.xlu2 %1142 }
 0x6a2   : > { %v1072_v47 = vsub.f32 1.5, %v1071_v40 }
 0x6a3   : > { %v1617_v42 = vpop.eup %1616  ;;  %v1113_v37 = vpop.permute.xlu0 %1112 }
 0x6a4   : > { %v1619_v44 = vpop.eup %1618  ;;  %v1059_v45 = vmul.f32 %v1617_v42, %v1045_v34  ;;  %v1073_v53 = vmul.f32 %v1615_v33, %v1072_v47  ;;  %vm1065_vm7 = vweird.f32 %v1617_v42  ;;  %v1539_v47 = vld [vmem:[%s2023_s7] sm:$0xff] }
 0x6a5   : > { %v1079_v48 = vmul.f32 %v1619_v44, %v1047_v12  ;;  %vm1085_vm9 = vweird.f32 %v1619_v44  ;;  %vm1066_vm13 = vmor %vm1064_vm12, %vm1065_vm7 }
 0x6a6   : > { %v1060_v49 = vmul.f32 %v1617_v42, %v1059_v45  ;;  %v1077_v61 = vsel %vm1076_vm11, %v1615_v33, %v1073_v53  ;;  %vm1086_vm15 = vmor %vm1084_vm14, %vm1085_vm9 }
 0x6a7   : > { %v1080_v50 = vmul.f32 %v1619_v44, %v1079_v48  ;;  %v1935_v2 = vmul.f32 %v1077_v61, %v1877_v63  ;;  %v1535_v63 = vld [vmem:[%s2021_s5] sm:$0xff]  ;;  %v1540_v48 = vld [vmem:[%s2023_s7 + $0x8] sm:$0xff] }
 0x6a8   : > { %v1061_v51 = vmul.f32 0.5, %v1060_v49  ;;  %v1123_v22 = vpop.permute.xlu2 %1122 }
 0x6a9   : > { %v1081_v54 = vmul.f32 0.5, %v1080_v50 }
 0x6aa   : > { %v1062_v56 = vsub.f32 1.5, %v1061_v51 }
 0x6ab   : > { %v1082_v57 = vsub.f32 1.5, %v1081_v54  ;;  %v1239_v54 = vpop.permute.xlu0 %1238 }
 0x6ac   : > { %v1063_v59 = vmul.f32 %v1617_v42, %v1062_v56 }
 0x6ad   : > { %v1083_v62 = vmul.f32 %v1619_v44, %v1082_v57 }
 0x6ae   : > { %v1067_v1 = vsel %vm1066_vm13, %v1617_v42, %v1063_v59 }
 0x6af   : > { %v1087_v0 = vsel %vm1086_vm15, %v1619_v44, %v1083_v62  ;;  %v1943_v6 = vmul.f32 %v1067_v1, %v1889_v7  ;;  %v1537_v7 = vld [vmem:[%s2021_s5 + $0x10] sm:$0xff] }
 0x6b0   : > { %v1938_v3 = vmul.f32 %v1087_v0, %v1887_v41  ;;  %v1536_v41 = vld [vmem:[%s2021_s5 + $0x8] sm:$0xff]  ;;  %v1133_v21 = vpop.permute.xlu1 %1132  ;;  %v1118_v34 = vpop.permute.xlu2 %1117 }
 0x6b1   : > { %v1100_v8 = vpack.c.bf16 %v1943_v6, %v1088_v39 }
 0x6b2   : > { %v1101_v5 = vpack.c.bf16 %v1938_v3, %v1935_v2 }
 0x6b4   : > { %1188 = vmatpush.bf16.msrb.mxu2 %v1101_v5 }
 0x6b8   : > { %1189 = vmatpush.bf16.msrb.mxu2 %v1100_v8  ;;  %v1128_v29 = vpop.permute.xlu1 %1127  ;;  %v1244_v61 = vpop.permute.xlu2 %1243 }
 0x6bb   : > { %1511 = vmatmul.msk.bf16.vlgmr.msrb.gmra.mxu2 %vm390_vm0, %v1535_v63 }
 0x6c0   : > { %v1234_v49 = vpop.permute.xlu1 %1233 }
 0x6c8   : > { %v1249_v5 = vpop.permute.xlu1 %1248 }
 0x6cb   : > { %1512 = vmatmul.msk.bf16.gmra.mxu2 %vm390_vm0, %v1536_v41 }
 0x6db   : > { %1513 = vmatmul.msk.bf16.gmra.mxu2 %vm390_vm0, %v1537_v7 }
 0x6eb   : > { %1514 = vmatmul.msk.bf16.gmra.mxu2 %vm390_vm0, %v1538_v58  ;;  %vm1261_vm0 = vcmask 523264  }
 0x73e   : > { %v1191_v9 = vpop.f32.mrf.mxu2 }
 0x73f   : > { %v1192_v38 = vadd.f32 %v1191_v9, %v1113_v37 }
 0x741   : > { %v1211_v45 = vmax.f32 %v1192_v38, 0.0 }
 0x746   : > { %v1193_v10 = vpop.f32.mrf.mxu2 }
 0x747   : > { %v1194_v12 = vadd.f32 %v1193_v10, %v1118_v34 }
 0x749   : > { %v1212_v42 = vmax.f32 %v1194_v12, 0.0 }
 0x74b   : > { %v1223_v46 = vpack.c.bf16 %v1212_v42, %v1211_v45 }
 0x74e   : > { %v1196_v11 = vpop.f32.mrf.mxu2 }
 0x74f   : > { %v1197_v15 = vadd.f32 %v1196_v11, %v1123_v22 }
 0x751   : > { %v1213_v40 = vmax.f32 %v1197_v15, 0.0 }
 0x756   : > { %v1198_v13 = vpop.f32.mrf.mxu2 }
 0x757   : > { %v1199_v30 = vadd.f32 %v1198_v13, %v1128_v29 }
 0x759   : > { %v1214_v35 = vmax.f32 %v1199_v30, 0.0 }
 0x75b   : > { %v1224_v44 = vpack.c.bf16 %v1214_v35, %v1213_v40 }
 0x75e   : > { %v1201_v14 = vpop.f32.mrf.mxu2 }
 0x75f   : > { %v1202_v26 = vadd.f32 %v1201_v14, %v1133_v21 }
 0x761   : > { %v1215_v33 = vmax.f32 %v1202_v26, 0.0 }
 0x766   : > { %v1203_v16 = vpop.f32.mrf.mxu2 }
 0x767   : > { %v1204_v24 = vadd.f32 %v1203_v16, %v1138_v23 }
 0x769   : > { %v1216_v31 = vmax.f32 %v1204_v24, 0.0 }
 0x76b   : > { %v1225_v36 = vpack.c.bf16 %v1216_v31, %v1215_v33 }
 0x76e   : > { %v1206_v20 = vpop.f32.mrf.mxu2 }
 0x76f   : > { %v1207_v19 = vadd.f32 %v1206_v20, %v1143_v17 }
 0x771   : > { %v1217_v27 = vmax.f32 %v1207_v19, 0.0 }
 0x776   : > { %v1208_v43 = vpop.f32.mrf.mxu2 }
 0x777   : > { %v1209_v25 = vadd.f32 %v1208_v43, %v1148_v18 }
 0x779   : > { %v1218_v28 = vmax.f32 %v1209_v25, 0.0 }
 0x77b   : > { %v1226_v32 = vpack.c.bf16 %v1218_v28, %v1217_v27 }
 0x77d   : > { %1272 = vmatpush.bf16.msra.mxu3 %v1226_v32 }
 0x781   : > { %1273 = vmatpush.bf16.msra.mxu3 %v1225_v36 }
 0x785   : > { %1274 = vmatpush.bf16.msra.mxu3 %v1224_v44 }
 0x789   : > { %1275 = vmatpush.bf16.msra.mxu3 %v1223_v46 }
 0x78c   : > { %1523 = vmatmul.msk.bf16.vlgmr.msra.gmra.mxu3 %vm1261_vm0, %v1539_v47 }
 0x79c   : > { %1524 = vmatmul.msk.bf16.gmra.mxu3 %vm1261_vm0, %v1540_v48 }
 0x80f   : > { %v1277_v50 = vpop.f32.mrf.mxu3 }
 0x810   : > { %v1278_v51 = vadd.f32 %v1277_v50, %v1234_v49 }
 0x812   : > { %v1287_v52 = vadd.f32 %v1278_v51, %v1088_v39 }
 0x814   : > { %v1291_v53 = vsel %vm920_vm3, %v1287_v52, 0.0 }
 0x815   : > { %1292 = vadd.xlane.f32.xlu0 %v1291_v53 }
 0x817   : > { %v1279_v56 = vpop.f32.mrf.mxu3 }
 0x818   : > { %v1280_v57 = vadd.f32 %v1279_v56, %v1239_v54 }
 0x81a   : > { %v1288_v59 = vadd.f32 %v1280_v57, %v1943_v6 }
 0x81c   : > { %v1294_v60 = vsel %vm920_vm3, %v1288_v59, 0.0 }
 0x81d   : > { %1295 = vadd.xlane.f32.xlu2 %v1294_v60 }
 0x81f   : > { %v1282_v62 = vpop.f32.mrf.mxu3 }
 0x820   : > { %v1283_v0 = vadd.f32 %v1282_v62, %v1244_v61 }
 0x822   : > { %v1289_v1 = vadd.f32 %v1283_v0, %v1935_v2 }
 0x824   : > { %v1297_v4 = vsel %vm920_vm3, %v1289_v1, 0.0 }
 0x825   : > { %1298 = vadd.xlane.f32.xlu1 %v1297_v4 }
 0x827   : > { %v1284_v39 = vpop.f32.mrf.mxu3 }
 0x828   : > { %v1285_v8 = vadd.f32 %v1284_v39, %v1249_v5 }
 0x82a   : > { %v1290_v63 = vadd.f32 %v1285_v8, %v1938_v3 }
 0x82c   : > { %v1300_v41 = vsel %vm920_vm3, %v1290_v63, 0.0 }
 0x82d   : > { %1301 = vadd.xlane.f32.xlu0 %v1300_v41 }
 0x888   : > { %v1293_v6 = vpop.xlane.xlu0 %1292 }
 0x889   : > { %v1303_v7 = vmul.f32 %v1293_v6, %v1868_v55 }
 0x88b   : > { %v1307_v58 = vsub.f32 %v1287_v52, %v1303_v7 }
 0x88d   : > { %v1311_v9 = vmul.f32 %v1307_v58, %v1307_v58 }
 0x88f   : > { %v1315_v10 = vsel %vm920_vm3, %v1311_v9, 0.0 }
 0x890   : > { %v1296_v11 = vpop.xlane.xlu2 %1295  ;;  %1316 = vadd.xlane.f32.xlu2 %v1315_v10 }
 0x891   : > { %v1304_v2 = vmul.f32 %v1296_v11, %v1868_v55 }
 0x893   : > { %v1308_v13 = vsub.f32 %v1288_v59, %v1304_v2 }
 0x895   : > { %v1312_v14 = vmul.f32 %v1308_v13, %v1308_v13 }
 0x897   : > { %v1318_v16 = vsel %vm920_vm3, %v1312_v14, 0.0 }
 0x898   : > { %v1299_v17 = vpop.xlane.xlu1 %1298  ;;  %1319 = vadd.xlane.f32.xlu1 %v1318_v16 }
 0x899   : > { %v1305_v3 = vmul.f32 %v1299_v17, %v1868_v55 }
 0x89b   : > { %v1981_v18 = vsub.f32 %v1289_v1, %v1305_v3 }
 0x89d   : > { %v1313_v20 = vmul.f32 %v1981_v18, %v1981_v18 }
 0x89f   : > { %v1321_v21 = vsel %vm920_vm3, %v1313_v20, 0.0 }
 0x8a0   : > { %1322 = vadd.xlane.f32.xlu0 %v1321_v21  ;;  %v1302_v22 = vpop.xlane.xlu0 %1301 }
 0x8a1   : > { %v1306_v19 = vmul.f32 %v1302_v22, %v1868_v55 }
 0x8a3   : > { %v1987_v23 = vsub.f32 %v1290_v63, %v1306_v19 }
 0x8a5   : > { %v1314_v43 = vmul.f32 %v1987_v23, %v1987_v23 }
 0x8a7   : > { %v1324_v24 = vsel %vm920_vm3, %v1314_v43, 0.0 }
 0x8a8   : > { %1325 = vadd.xlane.f32.xlu2 %v1324_v24 }
 0x903   : > { %v1317_v25 = vpop.xlane.xlu2 %1316 }
 0x904   : > { %v1327_v26 = vmul.f32 %v1317_v25, %v1868_v55 }
 0x906   : > { %v1331_v27 = vadd.f32 1e-05, %v1327_v26 }
 0x908   : > { %1620 = vrsqrt.f32 %v1331_v27  ;;  %vm1341_vm4 = vweird.f32 %v1331_v27 }
 0x90b   : > { %v1320_v28 = vpop.xlane.xlu1 %1319 }
 0x90c   : > { %v1328_v29 = vmul.f32 %v1320_v28, %v1868_v55 }
 0x90e   : > { %v1621_v30 = vpop.eup %1620  ;;  %v1332_v31 = vadd.f32 1e-05, %v1328_v29 }
 0x90f   : > { %v1336_v32 = vmul.f32 %v1621_v30, %v1331_v27  ;;  %vm1342_vm3 = vweird.f32 %v1621_v30 }
 0x910   : > { %1622 = vrsqrt.f32 %v1332_v31  ;;  %vm1343_vm5 = vmor %vm1341_vm4, %vm1342_vm3  ;;  %vm1351_vm8 = vweird.f32 %v1332_v31 }
 0x911   : > { %v1337_v15 = vmul.f32 %v1621_v30, %v1336_v32 }
 0x913   : > { %v1338_v33 = vmul.f32 0.5, %v1337_v15  ;;  %v1323_v34 = vpop.xlane.xlu0 %1322 }
 0x914   : > { %v1329_v12 = vmul.f32 %v1323_v34, %v1868_v55 }
 0x915   : > { %v1339_v35 = vsub.f32 1.5, %v1338_v33 }
 0x916   : > { %v1623_v36 = vpop.eup %1622  ;;  %v1333_v37 = vadd.f32 1e-05, %v1329_v12 }
 0x917   : > { %v1340_v38 = vmul.f32 %v1621_v30, %v1339_v35  ;;  %v1346_v40 = vmul.f32 %v1623_v36, %v1332_v31  ;;  %vm1352_vm7 = vweird.f32 %v1623_v36 }
 0x918   : > { %1624 = vrsqrt.f32 %v1333_v37  ;;  %vm1353_vm9 = vmor %vm1351_vm8, %vm1352_vm7  ;;  %vm1361_vm11 = vweird.f32 %v1333_v37 }
 0x919   : > { %v1344_v42 = vsel %vm1343_vm5, %v1621_v30, %v1340_v38  ;;  %v1347_v44 = vmul.f32 %v1623_v36, %v1346_v40 }
 0x91a   : > { %v1375_v45 = vmul.f32 %v1344_v42, %v1307_v58 }
 0x91b   : > { %v1348_v46 = vmul.f32 0.5, %v1347_v44  ;;  %v1326_v47 = vpop.xlane.xlu2 %1325 }
 0x91c   : > { %v1379_v48 = vpack.c.bf16 %v1375_v45, %v1375_v45  ;;  %v1330_v49 = vmul.f32 %v1326_v47, %v1868_v55 }
 0x91d   : > { %v1349_v50 = vsub.f32 1.5, %v1348_v46 }
 0x91e   : > { %v1625_v51 = vpop.eup %1624  ;;  %1384 = vst.msk [vmem:[%s2000_s25] sm:$0xf] %vm1383_vm6, %v1379_v48  ;;  %v1334_v52 = vadd.f32 1e-05, %v1330_v49 }
 0x91f   : > { %v1350_v53 = vmul.f32 %v1623_v36, %v1349_v50  ;;  %v1356_v54 = vmul.f32 %v1625_v51, %v1333_v37  ;;  %vm1362_vm10 = vweird.f32 %v1625_v51 }
 0x920   : > { %1626 = vrsqrt.f32 %v1334_v52  ;;  %vm1363_vm12 = vmor %vm1361_vm11, %vm1362_vm10  ;;  %vm1371_vm14 = vweird.f32 %v1334_v52 }
 0x921   : > { %v1354_v56 = vsel %vm1353_vm9, %v1623_v36, %v1350_v53  ;;  %v1357_v57 = vmul.f32 %v1625_v51, %v1356_v54 }
 0x922   : > { %v1376_v59 = vmul.f32 %v1354_v56, %v1308_v13 }
 0x923   : > { %v1358_v60 = vmul.f32 0.5, %v1357_v57 }
 0x924   : > { %v1380_v61 = vpack.c.bf16 %v1376_v59, %v1376_v59 }
 0x925   : > { %v1359_v62 = vsub.f32 1.5, %v1358_v60 }
 0x926   : > { %v1627_v55 = vpop.eup %1626  ;;  %1385 = vst.msk [vmem:[%s2000_s25 + $0x4] sm:$0xf] %vm1383_vm6, %v1380_v61 }
 0x927   : > { %v1360_v0 = vmul.f32 %v1625_v51, %v1359_v62  ;;  %v1366_v1 = vmul.f32 %v1627_v55, %v1334_v52  ;;  %vm1372_vm13 = vweird.f32 %v1627_v55 }
 0x928   : > { %vm1373_vm15 = vmor %vm1371_vm14, %vm1372_vm13 }
 0x929   : > { %v1364_v4 = vsel %vm1363_vm12, %v1625_v51, %v1360_v0  ;;  %v1367_v5 = vmul.f32 %v1627_v55, %v1366_v1 }
 0x92a   : > { %v1377_v39 = vmul.f32 %v1364_v4, %v1981_v18 }
 0x92b   : > { %v1368_v8 = vmul.f32 0.5, %v1367_v5 }
 0x92c   : > { %v1381_v63 = vpack.c.bf16 %v1377_v39, %v1377_v39 }
 0x92d   : > { %v1369_v41 = vsub.f32 1.5, %v1368_v8 }
 0x92e   : > { %1386 = vst.msk [vmem:[%s2000_s25 + $0x8] sm:$0xf] %vm1383_vm6, %v1381_v63 }
 0x92f   : > { %v1370_v6 = vmul.f32 %v1627_v55, %v1369_v41 }
 0x931   : > { %v1374_v7 = vsel %vm1373_vm15, %v1627_v55, %v1370_v6 }
 0x932   : > { %v1378_v58 = vmul.f32 %v1374_v7, %v1987_v23 }
 0x934   : > { %v1382_v9 = vpack.c.bf16 %v1378_v58, %v1378_v58 }
 0x936   : > { %1387 = vst.msk [vmem:[%s2000_s25 + $0xc] sm:$0xf] %vm1383_vm6, %v1382_v9 }
 0x937 PF: > { %s19_s30 = sadd.s32 1, %s1634_s30  }
 0x938   : > { %p16_p4 = scmp.ge.s32.totalorder %s19_s30, 4  }
 0x93a   :  { %18 = sbr.rel (!%p16_p4) target bundleno = 1 (0x1), region = 86 }

</bundles_post_ra>
